<compile_context>
chip_gen: v5e
topology: v5e:2x2
jax: 0.10.0
libtpu: 0.0.40
codegen_flags: <defaults>
</compile_context>

<pallas_src>
import functools

import jax
import jax.numpy as jnp
from jax.experimental import pallas as pl
from jax.experimental.pallas import tpu as pltpu

# ---- fixed layer sizes from the PyTorch module ----
H1 = 16          # fc1 out features
H2 = 8           # fc2 out features

# ---- packed-slab layout (bf16, all slices tile-aligned: 16 sublanes x 128 lanes) ----
LANE = 128                      # lane-dense padded width for hidden/output feature dims
IN_P = 16                       # rows reserved for w1 (input_size <= 16)
W1_OFF = 0                      # rows [  0,  16): w1 padded (IN_P, LANE)
W2_OFF = W1_OFF + IN_P          # rows [ 16, 144): w2 padded (LANE, LANE)
W3_OFF = W2_OFF + LANE          # rows [144, 272): w3 padded (LANE, LANE)
BIAS_OFF = W3_OFF + LANE        # rows [272, 288): b1 / b2 / b3 rows, rest zero
BIAS_ROWS = 16                  # full bf16 sublane tile
SLAB_ROWS = BIAS_OFF + BIAS_ROWS  # 288 rows total


def _round_up(n, m):
    return ((n + m - 1) // m) * m


def _dqn_kernel(x_ref, slab_ref, out_ref, *, in_features):
    f32 = jnp.float32
    bf16 = jnp.bfloat16

    x = x_ref[...].astype(bf16)                               # (TM, F) bf16

    w1 = slab_ref[W1_OFF:W1_OFF + in_features, :]             # (F, 128)  bf16
    w2 = slab_ref[W2_OFF:W2_OFF + LANE, :]                    # (128,128) bf16
    w3 = slab_ref[W3_OFF:W3_OFF + LANE, :]                    # (128,128) bf16
    bias = slab_ref[BIAS_OFF:BIAS_OFF + BIAS_ROWS, :].astype(f32)  # (16,128) f32
    b1 = bias[0:1, :]
    b2 = bias[1:2, :]
    b3 = bias[2:3, :]

    # fc1 + ReLU: bf16 MXU inputs, f32 accumulation, f32 bias add.
    h1 = jnp.dot(x, w1, preferred_element_type=f32) + b1      # (TM, 128) f32
    h1 = jnp.maximum(h1, 0.0).astype(bf16)                    # padded lanes stay 0
    # fc2 + ReLU
    h2 = jnp.dot(h1, w2, preferred_element_type=f32) + b2
    h2 = jnp.maximum(h2, 0.0).astype(bf16)
    # fc3 (cast on store -> bf16 lane-dense writeback)
    out = jnp.dot(h2, w3, preferred_element_type=f32) + b3
    out_ref[...] = out.astype(out_ref.dtype)


def pack_params(params, input_size, num_classes, dtype=jnp.bfloat16):
    """Pack (transposed) weights + biases into one zero-padded (288, 128) slab."""
    assert input_size <= IN_P and num_classes <= LANE
    slab = jnp.zeros((SLAB_ROWS, LANE), jnp.float32)
    slab = slab.at[W1_OFF:W1_OFF + input_size, 0:H1].set(params["w1"])
    slab = slab.at[W2_OFF:W2_OFF + H1, 0:H2].set(params["w2"])
    slab = slab.at[W3_OFF:W3_OFF + H2, 0:num_classes].set(params["w3"])
    slab = slab.at[BIAS_OFF + 0, 0:H1].set(params["b1"].reshape(-1))
    slab = slab.at[BIAS_OFF + 1, 0:H2].set(params["b2"].reshape(-1))
    slab = slab.at[BIAS_OFF + 2, 0:num_classes].set(params["b3"].reshape(-1))
    return slab.astype(dtype)


def dqn_forward(x, slab, *, tm=2048, out_dtype=jnp.bfloat16):
    """DQN forward.

    x:    (B, input_size) array (any float dtype; cast to bf16 in-kernel).
    slab: packed (288, 128) parameter slab from pack_params.

    Returns the lane-padded (B, 128) Q-value slab in `out_dtype`; columns
    [num_classes:128) are exactly 0.  Slice [:, :num_classes] lazily downstream
    (or fuse a max/argmax) so the slice does not become a separate HBM pass.
    """
    B, in_features = x.shape
    assert in_features <= IN_P

    # Clamp TM: multiple of 8, and no larger than ~half the batch so the grid keeps
    # >= 2 steps whenever B >= 16 (keeps both v7x TensorCores busy; harmless on
    # single-TC v5e/v6e).  Sweep tm in [2048, 4096] for very large replay batches.
    half = _round_up(max(pl.cdiv(B, 2), 8), 8)
    tm_eff = max(8, min(_round_up(tm, 8), half))
    grid_m = pl.cdiv(B, tm_eff)

    cost = pl.CostEstimate(
        flops=2 * B * (IN_P * LANE + 2 * LANE * LANE),
        transcendentals=0,
        bytes_accessed=(B * in_features * x.dtype.itemsize
                        + SLAB_ROWS * LANE * slab.dtype.itemsize
                        + B * LANE * jnp.dtype(out_dtype).itemsize),
    )

    kernel = functools.partial(_dqn_kernel, in_features=in_features)
    return pl.pallas_call(
        kernel,
        out_shape=jax.ShapeDtypeStruct((B, LANE), out_dtype),
        grid=(grid_m,),
        in_specs=[
            # x streams with the batch; last dim == full array dim satisfies (8,128) rule.
            pl.BlockSpec((tm_eff, in_features), lambda i: (i, 0)),
            # Weight slab: constant index_map -> fetched once, resident across tiles.
            pl.BlockSpec((SLAB_ROWS, LANE), lambda i: (0, 0)),
        ],
        out_specs=pl.BlockSpec((tm_eff, LANE), lambda i: (i, 0)),   # lane-dense stores
        compiler_params=pltpu.CompilerParams(
            dimension_semantics=("parallel",)),                     # megacore on v7x
        cost_estimate=cost,
    )(x, slab)


def init_params(key, input_size, num_classes):
    """Deterministic init mimicking nn.Linear's U(-1/sqrt(fan_in), 1/sqrt(fan_in)).
    Weights are stored transposed vs PyTorch: (in_features, out_features)."""
    dims = [(input_size, H1), (H1, H2), (H2, num_classes)]
    params = {}
    keys = jax.random.split(key, 2 * len(dims))
    for i, (fan_in, fan_out) in enumerate(dims):
        bound = 1.0 / jnp.sqrt(float(fan_in))
        params[f"w{i + 1}"] = jax.random.uniform(
            keys[2 * i], (fan_in, fan_out), minval=-bound, maxval=bound,
            dtype=jnp.float32)
        params[f"b{i + 1}"] = jax.random.uniform(
            keys[2 * i + 1], (1, fan_out), minval=-bound, maxval=bound,
            dtype=jnp.float32)
    return params


if __name__ == "__main__":
    key = jax.random.PRNGKey(0)
    k_x, k_p = jax.random.split(key)

    # Tic-tac-toe board: 9 cells in, 9 actions out; small demo batch.
    batch, input_size, num_classes = 64, 9, 9

    x = jax.random.normal(k_x, (batch, input_size), dtype=jnp.float32)
    params = init_params(k_p, input_size, num_classes)
    slab = pack_params(params, input_size, num_classes)

    out_full = dqn_forward(x, slab)                 # (64, 128) bf16; lanes >= 9 are 0
    out_full = jax.block_until_ready(out_full)
    q = out_full[:, :num_classes].astype(jnp.float32)

    # Pure-JAX references of the same math.
    def f32_ref(x, p):
        h1 = jnp.maximum(x @ p["w1"] + p["b1"], 0.0)
        h2 = jnp.maximum(h1 @ p["w2"] + p["b2"], 0.0)
        return h2 @ p["w3"] + p["b3"]

    def bf16_ref(x, p):
        bf = lambda a: a.astype(jnp.bfloat16).astype(jnp.float32)
        h1 = bf(jnp.maximum(bf(x) @ bf(p["w1"]) + bf(p["b1"]), 0.0))
        h2 = bf(jnp.maximum(h1 @ bf(p["w2"]) + bf(p["b2"]), 0.0))
        return h2 @ bf(p["w3"]) + bf(p["b3"])

    assert q.shape == (batch, num_classes)
    assert jnp.all(out_full[:, num_classes:] == 0)           # padded lanes exactly 0
    assert jnp.allclose(q, bf16_ref(x, params), atol=2e-2, rtol=2e-2)
    assert jnp.allclose(q, f32_ref(x, params), atol=5e-2, rtol=5e-2)

    print("KERNEL_OK")
</pallas_src>

<mosaic_0001>
module attributes {stable_mosaic.version = 11 : i64} {
  func.func @_dqn_kernel(%arg0: i32, %arg1: memref<32x9xf32, #tpu.memory_space<vmem>>, %arg2: memref<288x128xbf16, #tpu.memory_space<vmem>>, %arg3: memref<32x128xbf16, #tpu.memory_space<vmem>>) attributes {dimension_semantics = [#tpu.dimension_semantics<parallel>], iteration_bounds = array<i64: 2>, scalar_prefetch = 0 : i64, scratch_operands = 0 : i64, tpu.core_type = #tpu.core_type<tc>, window_params = [{transform_indices = @transform_0, window_bounds = array<i64: 32, 9>}, {pipeline_mode = #tpu.pipeline_mode<synchronous>, transform_indices = @transform_1, window_bounds = array<i64: 288, 128>}, {transform_indices = @transform_2, window_bounds = array<i64: 32, 128>}]} {
    %c0 = arith.constant 0 : index
    %c0_0 = arith.constant 0 : index
    %0 = vector.load %arg1[%c0, %c0_0] : memref<32x9xf32, #tpu.memory_space<vmem>>, vector<32x9xf32>
    %1 = arith.truncf %0 : vector<32x9xf32> to vector<32x9xbf16>
    %c0_1 = arith.constant 0 : index
    %c0_2 = arith.constant 0 : index
    %2 = vector.load %arg2[%c0_1, %c0_2] : memref<288x128xbf16, #tpu.memory_space<vmem>>, vector<9x128xbf16>
    %c16 = arith.constant 16 : index
    %c0_3 = arith.constant 0 : index
    %3 = vector.load %arg2[%c16, %c0_3] : memref<288x128xbf16, #tpu.memory_space<vmem>>, vector<128x128xbf16>
    %c144 = arith.constant 144 : index
    %c0_4 = arith.constant 0 : index
    %4 = vector.load %arg2[%c144, %c0_4] : memref<288x128xbf16, #tpu.memory_space<vmem>>, vector<128x128xbf16>
    %c272 = arith.constant 272 : index
    %c0_5 = arith.constant 0 : index
    %5 = vector.load %arg2[%c272, %c0_5] : memref<288x128xbf16, #tpu.memory_space<vmem>>, vector<16x128xbf16>
    %6 = arith.extf %5 : vector<16x128xbf16> to vector<16x128xf32>
    %7 = vector.extract_strided_slice %6 {offsets = [0, 0], sizes = [1, 128], strides = [1, 1]} : vector<16x128xf32> to vector<1x128xf32>
    %8 = vector.extract_strided_slice %6 {offsets = [1, 0], sizes = [1, 128], strides = [1, 1]} : vector<16x128xf32> to vector<1x128xf32>
    %9 = vector.extract_strided_slice %6 {offsets = [2, 0], sizes = [1, 128], strides = [1, 1]} : vector<16x128xf32> to vector<1x128xf32>
    %cst = arith.constant dense<0.000000e+00> : vector<32x128xf32>
    %10 = tpu.matmul %1, %2, %cst {dimension_numbers = #tpu.dot_dimension_numbers<[1], [0], [0], [1], [0, 0, 1, 1], [], []>} : vector<32x9xbf16>, vector<9x128xbf16>, vector<32x128xf32> -> vector<32x128xf32>
    %11 = vector.broadcast %7 : vector<1x128xf32> to vector<32x128xf32>
    %12 = arith.addf %10, %11 : vector<32x128xf32>
    %cst_6 = arith.constant 0.000000e+00 : f32
    %13 = vector.broadcast %cst_6 : f32 to vector<32x128xf32>
    %14 = arith.maximumf %12, %13 : vector<32x128xf32>
    %15 = arith.truncf %14 : vector<32x128xf32> to vector<32x128xbf16>
    %cst_7 = arith.constant dense<0.000000e+00> : vector<32x128xf32>
    %16 = tpu.matmul %15, %3, %cst_7 {dimension_numbers = #tpu.dot_dimension_numbers<[1], [0], [0], [1], [0, 0, 1, 1], [], []>} : vector<32x128xbf16>, vector<128x128xbf16>, vector<32x128xf32> -> vector<32x128xf32>
    %17 = vector.broadcast %8 : vector<1x128xf32> to vector<32x128xf32>
    %18 = arith.addf %16, %17 : vector<32x128xf32>
    %cst_8 = arith.constant 0.000000e+00 : f32
    %19 = vector.broadcast %cst_8 : f32 to vector<32x128xf32>
    %20 = arith.maximumf %18, %19 : vector<32x128xf32>
    %21 = arith.truncf %20 : vector<32x128xf32> to vector<32x128xbf16>
    %cst_9 = arith.constant dense<0.000000e+00> : vector<32x128xf32>
    %22 = tpu.matmul %21, %4, %cst_9 {dimension_numbers = #tpu.dot_dimension_numbers<[1], [0], [0], [1], [0, 0, 1, 1], [], []>} : vector<32x128xbf16>, vector<128x128xbf16>, vector<32x128xf32> -> vector<32x128xf32>
    %23 = vector.broadcast %9 : vector<1x128xf32> to vector<32x128xf32>
    %24 = arith.addf %22, %23 : vector<32x128xf32>
    %25 = arith.truncf %24 : vector<32x128xf32> to vector<32x128xbf16>
    %c0_10 = arith.constant 0 : index
    %c0_11 = arith.constant 0 : index
    %26 = vector.load %arg3[%c0_10, %c0_11] : memref<32x128xbf16, #tpu.memory_space<vmem>>, vector<32x128xbf16>
    tpu.vector_store %arg3[%c0_10, %c0_11], %25 {strides = array<i32>} : memref<32x128xbf16, #tpu.memory_space<vmem>>, vector<32x128xbf16>,
    return
  }
  func.func @transform_0(%arg0: i32) -> (i32, i32) {
    %c0_i32 = arith.constant 0 : i32
    %c0_i32_0 = arith.constant 0 : i32
    return %arg0, %c0_i32 : i32, i32
  }
  func.func @transform_1(%arg0: i32) -> (i32, i32) {
    %c0_i32 = arith.constant 0 : i32
    %c0_i32_0 = arith.constant 0 : i32
    %c0_i32_1 = arith.constant 0 : i32
    return %c0_i32, %c0_i32_0 : i32, i32
  }
  func.func @transform_2(%arg0: i32) -> (i32, i32) {
    %c0_i32 = arith.constant 0 : i32
    %c0_i32_0 = arith.constant 0 : i32
    return %arg0, %c0_i32 : i32, i32
  }
}

</mosaic_0001>

<bundles_post_ra>
// kernel: tpu_custom_call.1
= control target key start
LH: loop header
LB: loop body
LE: loop exit
PB: predicated region body
PF: predicated region fallthrough
CT: control target
= control target key end

     0   :  { %7 = vsyncpa [#allocation3], 0  ;;  %s887_s0 = inlined_call_operand.vmem [shape: f32[64,9], index: 0, kind: input, shape index: {}]   ;;  %s888_s1 = inlined_call_operand.hbm [shape: bf16[288,128], index: 1, kind: input, shape index: {}]   ;;  %s889_s2 = inlined_call_operand.hbm [shape: bf16[64,128], index: 2, kind: output, shape index: {}]  }
   0x1   :  { %8 = vsyncpa [#allocation4], 0 }
   0x2   :  { %10 = vsyncpa [#allocation4 + $0x1], 0  ;;  %s793_s9 = smov 0   ;;  %s795_s10 = smov 0  }
   0x3   :  { %s797_s11 = smov 0   ;;  %s799_s12 = smov 0  }
   0x4 LB: > { %s814_s13 = sadd.s32 4294967295, %s770_s12   ;;  %s490_s14 = sadd.s32 4294967294, %s770_s12   ;;  %s770_s12 = sphi %s799_s12, %s895_s12   ;;  %s766_s11 = sphi %s797_s11, %s894_s11   ;;  %s762_s10 = sphi %s795_s10, %s893_s10   ;;  %s758_s9 = sphi %s793_s9, %s892_s9  }
   0x5   : > { %s818_s15 = sadd.s32 1, %s770_s12   ;;  %s70_s16 = sadd.s32 1, %s766_s11 }
   0x6   : > { %s67_s17 = ssub.s32 %s770_s12, %s818_s15  ;;  %p80_p0 = scmp.ne.s32.totalorder %s766_s11, %s762_s10 }
   0x7   : > { %p68_p1 = scmp.eq.s32.totalorder %s67_s17, 0  ;;  %p81_p2 = scmp.eq.s32.totalorder %s814_s13, 1 }
   0x8   : > { %p86_p3 = scmp.ne.s32.totalorder %s762_s10, %s758_s9  ;;  %p87_p4 = scmp.eq.s32.totalorder %s490_s14, 1 }
   0x9   : > { %s829_s18 = scalar_select %p68_p1, %s766_s11, %s70_s16  }
   0xa   : > { %p831_p5 = por %p81_p2, %p80_p0  ;;  %p835_p6 = por %p87_p4, %p86_p3 }
   0xb   : > { %p491_p7 = scmp.ge.s32.totalorder %s770_s12, 1  ;;  %p94_p8 = scmp.lt.s32.totalorder %s770_s12, 3 }
   0xc   : > { %p633_p9 = scmp.eq.s32.totalorder %s814_s13, 0  ;;  %s105_s23 = sshll.u32 %s888_s1, 4  ;;  %s106_s23 = int_to_ptr.hbm [resolvable:$true] %s105_s23 }
   0xd   : > { %p95_p10 = pnand %p491_p7, %p94_p8  ;;  %s772_s24 = smov [#allocation2]  }
   0xe   : > { %s107_s25 = sshll.u32 %s772_s24, 4  ;;  %s773_s26 = smov 64   ;;  %s108_s25 = int_to_ptr.vmem [resolvable:$true] %s107_s25 }
   0xf   : > { %p625_p11 = pneg %p95_p10  ;;  %s774_s27 = smov 4  }
  0x10   : > { %132 = sbr.rel (%p95_p10) target bundleno = 481 (0x1e1), region = 28 }
  0x11   : > { %p626_p12 = pnand %p633_p9, %p625_p11 }
  0x13   : > { %628 = dma.hbm_to_vmem [thread:$0]  (!%p626_p12), %s106_s23, 2304, %s108_s25, [#allocation3], %s773_s26, %s773_s26, %s774_s27  }
  0x15   : > { %749 = dma.done.wait (%p633_p9), [#allocation3], 2304  }
  0x16   : > { %751 = vsyncadd (%p633_p9), [#allocation3], 4294964992  ;;  %s497_s28 = sshll.u32 %s814_s13, 2  ;;  %vm218_vm0 = vcmask 1043456   ;;  %vm219_vm1 = vcmask 1044480   ;;  %v775_v0 = vmov 65535  }
  0x17   : > { %p156_p13 = scmp.lt.s32.totalorder %s497_s28, 7  ;;  %v220_v1 = vsel %vm218_vm0, 4294967295, %v775_v0  ;;  %v501_v2 = vld [vmem:[#allocation2] sm:$0xf]  ;;  %v574_v3 = vld [vmem:[#allocation2] sm:$0x10] }
  0x18   : > { %v221_v4 = vsel %vm219_vm1, %v220_v1, 0  ;;  %v502_v5 = vor.u32 %v574_v3, %v501_v2  ;;  %v582_v8 = vld [vmem:[#allocation2 + $0x40] sm:$0xff]  ;;  %v581_v11 = vld [vmem:[#allocation2 + $0x38] sm:$0xff]  ;;  %vm211_vm2 = vcmask 72704   ;;  %v580_v12 = vld [vmem:[#allocation2 + $0x30] sm:$0xff]  ;;  %s152_s5 = sand.u32 1, %s762_s10  }
  0x19   : > { %s897_s28 = smov (!%p156_p13, %s497_s28), 7  ;;  %299 = vmatpush.bf16.msra.mxu1 %v582_v8  ;;  %603 = vmatpush.bf16.msra.mxu3 %v582_v8  ;;  %v579_v13 = vld [vmem:[#allocation2 + $0x28] sm:$0xff]  ;;  %v578_v17 = vld [vmem:[#allocation2 + $0x20] sm:$0xff]  ;;  %v577_v18 = vld [vmem:[#allocation2 + $0x18] sm:$0xff]  ;;  %s496_s6 = sshll.u32 %s152_s5, 4 }
  0x1a   : > { %s498_s29 = sshll.u32 %s897_s28, 3  ;;  %v223_v9 = vand.u32 %v502_v5, %v221_v4  ;;  %v576_v19 = vld [vmem:[#allocation2 + $0x10] sm:$0xff]  ;;  %v575_v20 = vld [vmem:[#allocation2 + $0x8] sm:$0xff]  ;;  %v590_v23 = vld [vmem:[#allocation2 + $0x80] sm:$0xff]  ;;  %s154_s7 = scalar_lea.vmem [#allocation5], %s496_s6 }
  0x1b   : > { %s159_s4 = scalar_lea.vmem %s887_s0, %s498_s29  ;;  %v203_v21 = vld [vmem:[#allocation2 + $0x88] sm:$0xf]  ;;  %v589_v25 = vld [vmem:[#allocation2 + $0x78] sm:$0xff]  ;;  %611 = vmatpush.bf16.msra.mxu2 %v590_v23  ;;  %v588_v27 = vld [vmem:[#allocation2 + $0x70] sm:$0xff]  ;;  %s591_s8 = sshll.u32 %s814_s13, 4 }
  0x1c   : > { %v163_v6 = vld [vmem:[%s159_s4] sm:$0xff]  ;;  %v164_v7 = vld [vmem:[%s159_s4 + $0x8] sm:$0xff]  ;;  %232 = vmatpush.bf16.msra.mxu0 %v223_v9  ;;  %v165_v14 = vld [vmem:[%s159_s4 + $0x10] sm:$0xff]  ;;  %v204_v22 = vunpack.c.l.bf16 %v203_v21  ;;  %s412_s17 = scalar_lea.hbm %s889_s2, %s591_s8  ;;  %s413_s21 = sshll.u32 %s154_s7, 4  ;;  %s414_s21 = int_to_ptr.vmem [resolvable:$true] %s413_s21 }
  0x1d   : > { %v167_v10 = vpack.c.bf16 %v164_v7, %v163_v6  ;;  %300 = vmatpush.bf16.msra.mxu1 %v581_v11  ;;  %604 = vmatpush.bf16.msra.mxu3 %v581_v11  ;;  %v166_v15 = vld [vmem:[%s159_s4 + $0x18] sm:$0xff]  ;;  %v587_v31 = vld [vmem:[#allocation2 + $0x68] sm:$0xff]  ;;  %v586_v42 = vld [vmem:[#allocation2 + $0x60] sm:$0xff]  ;;  %s415_s22 = sshll.u32 %s412_s17, 4  ;;  %s401_s23 = scalar_lea.sflag [#allocation4], %s152_s5  ;;  %s416_s22 = int_to_ptr.hbm [resolvable:$true] %s415_s22 }
  0x1e   : > { %v168_v16 = vpack.c.bf16 %v166_v15, %v165_v14  ;;  %v205_v26 = vperm.slane %v204_v22, 0  ;;  %v585_v43 = vld [vmem:[#allocation2 + $0x58] sm:$0xff]  ;;  %v584_v44 = vld [vmem:[#allocation2 + $0x50] sm:$0xff]  ;;  %v583_v45 = vld [vmem:[#allocation2 + $0x48] sm:$0xff]  ;;  %v250_v47 = vperm.slane %v204_v22, 1  ;;  %v324_v62 = vperm.slane %v204_v22, 2 }
  0x1f   : > { %503 = vmatmul.msk.bf16.vlgmr.msra.gmra.mxu0 %vm211_vm2, %v167_v10  ;;  %612 = vmatpush.bf16.msra.mxu2 %v589_v25  ;;  %s718_s24 = sshra.s32 %s416_s22, 4  ;;  %s724_s27 = scalar_lea.hbm %s889_s2, 32  ;;  %s719_s24 = int_to_ptr.hbm [resolvable:$true] %s718_s24 }
  0x20   : > { %373 = vmatpush.bf16.msrb.mxu0 %v590_v23  ;;  %s720_s25 = scalar_lea.hbm %s719_s24, 16  ;;  %p725_p3 = scmp.lt.s32.totalorder %s719_s24, %s889_s2 }
  0x21   : > { %301 = vmatpush.bf16.msra.mxu1 %v580_v12  ;;  %605 = vmatpush.bf16.msra.mxu3 %v580_v12  ;;  %p721_p0 = scmp.ne.s32.totalorder %s719_s24, %s720_s25  ;;  %p726_p4 = scmp.lt.s32.totalorder %s724_s27, %s720_s25 }
  0x23   : > { %613 = vmatpush.bf16.msra.mxu2 %v588_v27  ;;  %p722_p1 = pnand %p721_p0, %p831_p5  ;;  %p727_p7 = por %p726_p4, %p725_p3 }
  0x24   : > { %374 = vmatpush.bf16.msrb.mxu0 %v589_v25 }
  0x25   : > { %302 = vmatpush.bf16.msra.mxu1 %v579_v13  ;;  %606 = vmatpush.bf16.msra.mxu3 %v579_v13  ;;  %p723_p2 = pneg %p722_p1 }
  0x27   : > { %614 = vmatpush.bf16.msra.mxu2 %v587_v31  ;;  %p728_p8 = pnand %p727_p7, %p723_p2 }
  0x28   : > { %375 = vmatpush.bf16.msrb.mxu0 %v588_v27 }
  0x29   : > { %303 = vmatpush.bf16.msra.mxu1 %v578_v17  ;;  %607 = vmatpush.bf16.msra.mxu3 %v578_v17 }
  0x2b   : > { %615 = vmatpush.bf16.msra.mxu2 %v586_v42 }
  0x2c   : > { %376 = vmatpush.bf16.msrb.mxu0 %v587_v31 }
  0x2d   : > { %304 = vmatpush.bf16.msra.mxu1 %v577_v18  ;;  %608 = vmatpush.bf16.msra.mxu3 %v577_v18 }
  0x2f   : > { %504 = vmatmul.msk.bf16.gmra.mxu0 %vm211_vm2, %v168_v16  ;;  %616 = vmatpush.bf16.msra.mxu2 %v585_v43 }
  0x30   : > { %377 = vmatpush.bf16.msrb.mxu0 %v586_v42 }
  0x31   : > { %305 = vmatpush.bf16.msra.mxu1 %v576_v19  ;;  %609 = vmatpush.bf16.msra.mxu3 %v576_v19 }
  0x33   : > { %617 = vmatpush.bf16.msra.mxu2 %v584_v44 }
  0x34   : > { %378 = vmatpush.bf16.msrb.mxu0 %v585_v43 }
  0x35   : > { %306 = vmatpush.bf16.msra.mxu1 %v575_v20  ;;  %610 = vmatpush.bf16.msra.mxu3 %v575_v20 }
  0x37   : > { %618 = vmatpush.bf16.msra.mxu2 %v583_v45 }
  0x38   : > { %379 = vmatpush.bf16.msrb.mxu0 %v584_v44 }
  0x3c   : > { %380 = vmatpush.bf16.msrb.mxu0 %v583_v45 }
  0x9c   : > { %v234_v24 = vpop.f32.mrf.mxu0 }
  0x9d   : > { %v235_v28 = vadd.f32 %v234_v24, %v205_v26 }
  0x9f   : > { %v244_v32 = vmax.f32 %v235_v28, 0.0 }
  0xa4   : > { %v236_v29 = vpop.f32.mrf.mxu0 }
  0xa5   : > { %v237_v30 = vadd.f32 %v236_v29, %v205_v26 }
  0xa7   : > { %v245_v33 = vmax.f32 %v237_v30, 0.0 }
  0xa9   : > { %v248_v34 = vpack.c.bf16 %v245_v33, %v244_v32 }
  0xab   : > { %307 = vmatmul.bf16.vlgmr.msra.gmra.mxu1 %v248_v34 }
  0xac   : > { %v239_v35 = vpop.f32.mrf.mxu0 }
  0xad   : > { %v240_v36 = vadd.f32 %v239_v35, %v205_v26 }
  0xaf   : > { %v246_v39 = vmax.f32 %v240_v36, 0.0 }
  0xb4   : > { %v241_v37 = vpop.f32.mrf.mxu0 }
  0xb5   : > { %v242_v38 = vadd.f32 %v241_v37, %v205_v26 }
  0xb7   : > { %v247_v40 = vmax.f32 %v242_v38, 0.0 }
  0xb9   : > { %v249_v41 = vpack.c.bf16 %v247_v40, %v246_v39 }
  0xbb   : > { %312 = vmatmul.bf16.vlgmr.msra.gmra.mxu3 %v249_v41 }
 0x128   : > { %v308_v46 = vpop.f32.mrf.mxu1 }
 0x129   : > { %v309_v48 = vadd.f32 %v308_v46, %v250_v47 }
 0x12b   : > { %v318_v51 = vmax.f32 %v309_v48, 0.0 }
 0x130   : > { %v310_v49 = vpop.f32.mrf.mxu1 }
 0x131   : > { %v311_v50 = vadd.f32 %v310_v49, %v250_v47 }
 0x133   : > { %v319_v52 = vmax.f32 %v311_v50, 0.0 }
 0x135   : > { %v322_v53 = vpack.c.bf16 %v319_v52, %v318_v51 }
 0x137   : > { %381 = vmatmul.bf16.vlgmr.msrb.gmra.mxu0 %v322_v53 }
 0x13e   : > { %v313_v54 = vpop.f32.mrf.mxu3 }
 0x13f   : > { %v314_v55 = vadd.f32 %v313_v54, %v250_v47 }
 0x141   : > { %v320_v58 = vmax.f32 %v314_v55, 0.0 }
 0x146   : > { %v315_v56 = vpop.f32.mrf.mxu3 }
 0x147   : > { %v316_v57 = vadd.f32 %v315_v56, %v250_v47 }
 0x149   : > { %v321_v59 = vmax.f32 %v316_v57, 0.0 }
 0x14b   : > { %v323_v60 = vpack.c.bf16 %v321_v59, %v320_v58 }
 0x14d   : > { %386 = vmatmul.bf16.vlgmr.msra.gmra.mxu2 %v323_v60 }
 0x1b4   : > { %v382_v61 = vpop.f32.mrf.mxu0 }
 0x1b5   : > { %v383_v0 = vadd.f32 %v382_v61, %v324_v62 }
 0x1bc   : > { %v384_v63 = vpop.f32.mrf.mxu0 }
 0x1bd   : > { %v385_v1 = vadd.f32 %v384_v63, %v324_v62 }
 0x1bf   : > { %v595_v2 = vpack.c.bf16 %v385_v1, %v383_v0 }
 0x1c1   : > { %596 = vst [vmem:[%s154_s7] sm:$0xff] %v595_v2  }
 0x1d0   : > { %v387_v3 = vpop.f32.mrf.mxu2 }
 0x1d1   : > { %v388_v5 = vadd.f32 %v387_v3, %v324_v62 }
 0x1d8   : > { %v389_v4 = vpop.f32.mrf.mxu2 }
 0x1d9   : > { %v390_v6 = vadd.f32 %v389_v4, %v324_v62 }
 0x1db   : > { %v600_v7 = vpack.c.bf16 %v390_v6, %v388_v5 }
 0x1dd   : > { %602 = vst [vmem:[%s154_s7 + $0x8] sm:$0xff] %v600_v7  }
 0x1de   : > { %731 = shalt.err (!%p728_p8)
}
 0x1df   : > { %s776_s30 = smov 64   ;;  %s777_s3 = smov 4  }
 0x1e0   : > { %623 = dma.vmem_to_hbm [thread:$0]  (%p831_p5), %s414_s21, 256, %s416_s22, %s401_s23, %s776_s30, %s776_s30, %s777_s3  }
 0x1e1 PF: > { %p635_p9 = scmp.ge.s32.totalorder %s770_s12, 2  ;;  %s430_s4 = sand.u32 1, %s758_s9  }
 0x1e2   : > { %s431_s5 = scalar_lea.sflag [#allocation4], %s430_s4 }
 0x1e3   : > { %p630_p10 = pnand %p635_p9, %p835_p6 }
 0x1e5   : > { %p631_p11 = pneg %p630_p10 }
 0x1e7   : > { %753 = dma.done.wait (%p631_p11), %s431_s5, 256  }
 0x1e8   : > { %755 = vsyncadd (%p631_p11), %s431_s5, 4294967040  ;;  %p13_p12 = scmp.ge.s32.totalorder %s818_s15, 4   ;;  %s892_s9 = smov %s762_s10 }
 0x1e9   : > { %s893_s10 = smov %s766_s11  ;;  %s894_s11 = smov %s829_s18 }
 0x1ea   : > { %s895_s12 = smov %s818_s15  ;;  %15 = sbr.rel (!%p13_p12) target bundleno = 4 (0x4), region = 68 }
 0x1ef   :  { %437 = vsyncpa [#allocation3], 1 }
 0x1f0   :  { %439 = vsyncpa [#allocation3 + $0x1], 1 }
 0x1f1   :  { %440 = vsyncpa [#allocation4], 1 }
 0x1f2   :  { %442 = vsyncpa [#allocation4 + $0x1], 1 }

</bundles_post_ra>
